<compile_context>
chip_gen: v6e
topology: v6e:2x2x1
jax: 0.10.0
libtpu: 0.0.40
codegen_flags: <defaults>
</compile_context>

<pallas_src>
import functools

import numpy as np
import jax
import jax.numpy as jnp
from jax.experimental import pallas as pl
from jax.experimental.pallas import tpu as pltpu


def _round_up(n, m):
    return ((n + m - 1) // m) * m


def bddqn_kernel(x_ref,
                 w1_ref, b1_ref, w2_ref, b2_ref, w3_ref, b3_ref,
                 w4_ref, b4_ref, w5_ref, b5_ref,
                 wq_ref, bq_ref, o_ref):
    def dense_relu(h_bf16, w_ref, b_ref):
        # bf16 operands -> MXU, f32 accumulate; bias add + ReLU in f32 on VPU.
        y = jnp.dot(h_bf16, w_ref[...],
                    preferred_element_type=jnp.float32) + b_ref[...]
        return jnp.maximum(y, 0.0)

    h = x_ref[...]                                           # bf16 (TB, obs_eff)
    h = dense_relu(h, w1_ref, b1_ref).astype(jnp.bfloat16)
    h = dense_relu(h, w2_ref, b2_ref).astype(jnp.bfloat16)
    h = dense_relu(h, w3_ref, b3_ref).astype(jnp.bfloat16)
    h = dense_relu(h, w4_ref, b4_ref).astype(jnp.bfloat16)
    h = dense_relu(h, w5_ref, b5_ref)                        # f32 (TB, out_size)

    # Folded dueling head: Q = h @ Wq + bq (exact linear fold, f32 matmul).
    q = jnp.dot(h, wq_ref[...], preferred_element_type=jnp.float32) + bq_ref[...]
    o_ref[...] = q                                           # (TB, P) dense store


@functools.partial(jax.jit, static_argnames=("num_fcs", "n_actions"))
def bddqn_forward(x, params, *, num_fcs, n_actions):
    """Fused BranchDuelingDQNMulti forward.

    x: (B, obs_size * num_fcs) -> Q: (B, num_fcs, n_actions), float32.
    """
    (w1, b1, w2, b2, w3, b3, w4, b4, w5, b5, wv, bv, wa, ba) = params
    B, obs_eff = x.shape
    out_size = wv.shape[0]
    F = num_fcs
    A = n_actions
    FA = F * A
    P = _round_up(max(FA, 128), 128)              # lane-dense padded output width

    # bf16 weights for the MXU trunk; biases stay f32.
    to_bf = lambda w: w.astype(jnp.bfloat16)
    w1b, w2b, w3b, w4b, w5b = map(to_bf, (w1, w2, w3, w4, w5))
    x_bf = x.astype(jnp.float32).astype(jnp.bfloat16)        # matches in-kernel cast

    # Fold value + advantage + dueling combine into a single f32 linear head.
    wa_r = wa.astype(jnp.float32).reshape(out_size, F, A)
    wq_full = (wa_r - wa_r.mean(axis=-1, keepdims=True)
               + wv.astype(jnp.float32).reshape(out_size, F, 1)).reshape(out_size, FA)
    ba_r = ba.astype(jnp.float32).reshape(1, F, A)
    bq_full = (ba_r - ba_r.mean(axis=-1, keepdims=True)
               + bv.astype(jnp.float32).reshape(1, F, 1)).reshape(1, FA)
    wq = jnp.zeros((out_size, P), jnp.float32).at[:, :FA].set(wq_full)
    bq = jnp.zeros((1, P), jnp.float32).at[:, :FA].set(bq_full)

    # Batch tiling: TB multiple of 8, pad B up so the grid divides evenly.
    TB = min(512, _round_up(B, 8))
    Bpad = _round_up(B, TB)
    if Bpad != B:
        x_bf = jnp.pad(x_bf, ((0, Bpad - B), (0, 0)))
    grid = (Bpad // TB,)

    consts = (w1b, b1, w2b, b2, w3b, b3, w4b, b4, w5b, b5, wq, bq)

    def const_spec(shape):
        return pl.BlockSpec(shape, lambda i: (0,) * len(shape))

    # Advisory cost estimate (trunk + folded head matmuls).
    mm_dims = [(obs_eff, w1.shape[1]), (w1.shape[1], w2.shape[1]),
               (w2.shape[1], w3.shape[1]), (w3.shape[1], w4.shape[1]),
               (w4.shape[1], w5.shape[1]), (out_size, P)]
    flops = int(2 * Bpad * sum(a * b for a, b in mm_dims))
    bytes_accessed = int(x_bf.size * x_bf.dtype.itemsize
                         + sum(int(a.size) * a.dtype.itemsize for a in consts)
                         + Bpad * P * 4)

    out = pl.pallas_call(
        bddqn_kernel,
        out_shape=jax.ShapeDtypeStruct((Bpad, P), jnp.float32),
        grid=grid,
        in_specs=[pl.BlockSpec((TB, obs_eff), lambda i: (i, 0))]
                 + [const_spec(a.shape) for a in consts],
        out_specs=pl.BlockSpec((TB, P), lambda i: (i, 0)),
        compiler_params=pltpu.CompilerParams(
            dimension_semantics=("parallel",)),
        cost_estimate=pl.CostEstimate(
            flops=flops, transcendentals=0, bytes_accessed=bytes_accessed),
    )(x_bf, *consts)

    return out[:B, :FA].reshape(B, F, A)


def init_params(key, obs_eff, n_actions, num_fcs,
                hidden_size=256, middle_size1=128, middle_size2=64, out_size=32):
    """torch.nn.Linear-style init (uniform +/- 1/sqrt(fan_in)).

    Weights are returned already transposed to (in_features, out_features);
    biases are (1, out_features) float32."""
    def linear(k, fan_in, fan_out):
        kw, kb = jax.random.split(k)
        bound = 1.0 / np.sqrt(float(fan_in))
        w = jax.random.uniform(kw, (fan_in, fan_out), jnp.float32, -bound, bound)
        b = jax.random.uniform(kb, (1, fan_out), jnp.float32, -bound, bound)
        return w, b

    dims = [obs_eff, hidden_size, middle_size1, middle_size1, middle_size2, out_size]
    keys = jax.random.split(key, 7)
    params = []
    for i in range(5):                               # feature trunk
        params.extend(linear(keys[i], dims[i], dims[i + 1]))
    params.extend(linear(keys[5], out_size, num_fcs))                # value head
    params.extend(linear(keys[6], out_size, num_fcs * n_actions))    # advantage head
    return tuple(params)


def reference_forward(x, params, num_fcs, n_actions, trunk_dtype=jnp.float32):
    """Pure-JAX reference mirroring the PyTorch forward (heads/dueling in f32)."""
    (w1, b1, w2, b2, w3, b3, w4, b4, w5, b5, wv, bv, wa, ba) = params

    def dense(h, w, b, relu=True, dtype=jnp.float32):
        y = jnp.dot(h.astype(dtype), w.astype(dtype),
                    preferred_element_type=jnp.float32) + b
        return jnp.maximum(y, 0.0) if relu else y

    h = x.astype(jnp.float32)
    for w, b in ((w1, b1), (w2, b2), (w3, b3), (w4, b4), (w5, b5)):
        h = dense(h, w, b, dtype=trunk_dtype)
    value = dense(h, wv, bv, relu=False)                              # (B, F)
    adv = dense(h, wa, ba, relu=False).reshape(-1, num_fcs, n_actions)
    return value[:, :, None] + adv - adv.mean(axis=-1, keepdims=True)


if __name__ == "__main__":
    # Small shapes consistent with the module defaults:
    # obs_size=32, num_fcs=4 -> effective obs 128; n_actions=6; batch=16.
    obs_size, n_actions, num_fcs = 32, 6, 4
    obs_eff = obs_size * num_fcs
    batch = 16

    key = jax.random.PRNGKey(0)
    kx, kp = jax.random.split(key)
    x = jax.random.normal(kx, (batch, obs_eff), jnp.float32)
    params = init_params(kp, obs_eff, n_actions, num_fcs)

    out = bddqn_forward(x, params, num_fcs=num_fcs, n_actions=n_actions)
    out = jax.block_until_ready(out)

    ref_bf16 = reference_forward(x, params, num_fcs, n_actions, trunk_dtype=jnp.bfloat16)
    ref_f32 = reference_forward(x, params, num_fcs, n_actions, trunk_dtype=jnp.float32)

    assert out.shape == (batch, num_fcs, n_actions)
    # Tight check vs a reference with identical bf16-trunk / f32-head numerics
    # (only f32 rounding-order differences from the folded dueling head).
    assert jnp.allclose(out, ref_bf16, atol=2e-3, rtol=2e-3), "mismatch vs bf16-trunk reference"
    # Loose check vs the full-f32 module semantics (bf16 MXU trunk is the only delta).
    assert jnp.allclose(out, ref_f32, atol=5e-2, rtol=5e-2), "mismatch vs f32 reference"

    print("KERNEL_OK")
</pallas_src>

<mosaic_0001>
module attributes {stable_mosaic.version = 11 : i64} {
  func.func @bddqn_kernel(%arg0: i32, %arg1: memref<16x128xbf16, #tpu.memory_space<vmem>>, %arg2: memref<128x256xbf16, #tpu.memory_space<vmem>>, %arg3: memref<1x256xf32, #tpu.memory_space<vmem>>, %arg4: memref<256x128xbf16, #tpu.memory_space<vmem>>, %arg5: memref<1x128xf32, #tpu.memory_space<vmem>>, %arg6: memref<128x128xbf16, #tpu.memory_space<vmem>>, %arg7: memref<1x128xf32, #tpu.memory_space<vmem>>, %arg8: memref<128x64xbf16, #tpu.memory_space<vmem>>, %arg9: memref<1x64xf32, #tpu.memory_space<vmem>>, %arg10: memref<64x32xbf16, #tpu.memory_space<vmem>>, %arg11: memref<1x32xf32, #tpu.memory_space<vmem>>, %arg12: memref<32x128xf32, #tpu.memory_space<vmem>>, %arg13: memref<1x128xf32, #tpu.memory_space<vmem>>, %arg14: memref<16x128xf32, #tpu.memory_space<vmem>>) attributes {dimension_semantics = [#tpu.dimension_semantics<parallel>], iteration_bounds = array<i64: 1>, scalar_prefetch = 0 : i64, scratch_operands = 0 : i64, tpu.core_type = #tpu.core_type<tc>, window_params = [{transform_indices = @transform_0, window_bounds = array<i64: 16, 128>}, {pipeline_mode = #tpu.pipeline_mode<synchronous>, transform_indices = @transform_1, window_bounds = array<i64: 128, 256>}, {pipeline_mode = #tpu.pipeline_mode<synchronous>, transform_indices = @transform_2, window_bounds = array<i64: 1, 256>}, {pipeline_mode = #tpu.pipeline_mode<synchronous>, transform_indices = @transform_3, window_bounds = array<i64: 256, 128>}, {pipeline_mode = #tpu.pipeline_mode<synchronous>, transform_indices = @transform_4, window_bounds = array<i64: 1, 128>}, {pipeline_mode = #tpu.pipeline_mode<synchronous>, transform_indices = @transform_5, window_bounds = array<i64: 128, 128>}, {pipeline_mode = #tpu.pipeline_mode<synchronous>, transform_indices = @transform_6, window_bounds = array<i64: 1, 128>}, {pipeline_mode = #tpu.pipeline_mode<synchronous>, transform_indices = @transform_7, window_bounds = array<i64: 128, 64>}, {pipeline_mode = #tpu.pipeline_mode<synchronous>, transform_indices = @transform_8, window_bounds = array<i64: 1, 64>}, {pipeline_mode = #tpu.pipeline_mode<synchronous>, transform_indices = @transform_9, window_bounds = array<i64: 64, 32>}, {pipeline_mode = #tpu.pipeline_mode<synchronous>, transform_indices = @transform_10, window_bounds = array<i64: 1, 32>}, {pipeline_mode = #tpu.pipeline_mode<synchronous>, transform_indices = @transform_11, window_bounds = array<i64: 32, 128>}, {pipeline_mode = #tpu.pipeline_mode<synchronous>, transform_indices = @transform_12, window_bounds = array<i64: 1, 128>}, {transform_indices = @transform_13, window_bounds = array<i64: 16, 128>}]} {
    %c0 = arith.constant 0 : index
    %c0_0 = arith.constant 0 : index
    %0 = vector.load %arg1[%c0, %c0_0] : memref<16x128xbf16, #tpu.memory_space<vmem>>, vector<16x128xbf16>
    %c0_1 = arith.constant 0 : index
    %c0_2 = arith.constant 0 : index
    %1 = vector.load %arg2[%c0_1, %c0_2] : memref<128x256xbf16, #tpu.memory_space<vmem>>, vector<128x256xbf16>
    %cst = arith.constant dense<0.000000e+00> : vector<16x256xf32>
    %2 = tpu.matmul %0, %1, %cst {dimension_numbers = #tpu.dot_dimension_numbers<[1], [0], [0], [1], [0, 0, 1, 1], [], []>} : vector<16x128xbf16>, vector<128x256xbf16>, vector<16x256xf32> -> vector<16x256xf32>
    %c0_3 = arith.constant 0 : index
    %c0_4 = arith.constant 0 : index
    %3 = vector.load %arg3[%c0_3, %c0_4] : memref<1x256xf32, #tpu.memory_space<vmem>>, vector<1x256xf32>
    %4 = vector.broadcast %3 : vector<1x256xf32> to vector<16x256xf32>
    %5 = arith.addf %2, %4 : vector<16x256xf32>
    %cst_5 = arith.constant 0.000000e+00 : f32
    %6 = vector.broadcast %cst_5 : f32 to vector<16x256xf32>
    %7 = arith.maximumf %5, %6 : vector<16x256xf32>
    %8 = arith.truncf %7 : vector<16x256xf32> to vector<16x256xbf16>
    %c0_6 = arith.constant 0 : index
    %c0_7 = arith.constant 0 : index
    %9 = vector.load %arg4[%c0_6, %c0_7] : memref<256x128xbf16, #tpu.memory_space<vmem>>, vector<256x128xbf16>
    %cst_8 = arith.constant dense<0.000000e+00> : vector<16x128xf32>
    %10 = tpu.matmul %8, %9, %cst_8 {dimension_numbers = #tpu.dot_dimension_numbers<[1], [0], [0], [1], [0, 0, 1, 1], [], []>} : vector<16x256xbf16>, vector<256x128xbf16>, vector<16x128xf32> -> vector<16x128xf32>
    %c0_9 = arith.constant 0 : index
    %c0_10 = arith.constant 0 : index
    %11 = vector.load %arg5[%c0_9, %c0_10] : memref<1x128xf32, #tpu.memory_space<vmem>>, vector<1x128xf32>
    %12 = vector.broadcast %11 : vector<1x128xf32> to vector<16x128xf32>
    %13 = arith.addf %10, %12 : vector<16x128xf32>
    %cst_11 = arith.constant 0.000000e+00 : f32
    %14 = vector.broadcast %cst_11 : f32 to vector<16x128xf32>
    %15 = arith.maximumf %13, %14 : vector<16x128xf32>
    %16 = arith.truncf %15 : vector<16x128xf32> to vector<16x128xbf16>
    %c0_12 = arith.constant 0 : index
    %c0_13 = arith.constant 0 : index
    %17 = vector.load %arg6[%c0_12, %c0_13] : memref<128x128xbf16, #tpu.memory_space<vmem>>, vector<128x128xbf16>
    %cst_14 = arith.constant dense<0.000000e+00> : vector<16x128xf32>
    %18 = tpu.matmul %16, %17, %cst_14 {dimension_numbers = #tpu.dot_dimension_numbers<[1], [0], [0], [1], [0, 0, 1, 1], [], []>} : vector<16x128xbf16>, vector<128x128xbf16>, vector<16x128xf32> -> vector<16x128xf32>
    %c0_15 = arith.constant 0 : index
    %c0_16 = arith.constant 0 : index
    %19 = vector.load %arg7[%c0_15, %c0_16] : memref<1x128xf32, #tpu.memory_space<vmem>>, vector<1x128xf32>
    %20 = vector.broadcast %19 : vector<1x128xf32> to vector<16x128xf32>
    %21 = arith.addf %18, %20 : vector<16x128xf32>
    %cst_17 = arith.constant 0.000000e+00 : f32
    %22 = vector.broadcast %cst_17 : f32 to vector<16x128xf32>
    %23 = arith.maximumf %21, %22 : vector<16x128xf32>
    %24 = arith.truncf %23 : vector<16x128xf32> to vector<16x128xbf16>
    %c0_18 = arith.constant 0 : index
    %c0_19 = arith.constant 0 : index
    %25 = vector.load %arg8[%c0_18, %c0_19] : memref<128x64xbf16, #tpu.memory_space<vmem>>, vector<128x64xbf16>
    %cst_20 = arith.constant dense<0.000000e+00> : vector<16x64xf32>
    %26 = tpu.matmul %24, %25, %cst_20 {dimension_numbers = #tpu.dot_dimension_numbers<[1], [0], [0], [1], [0, 0, 1, 1], [], []>} : vector<16x128xbf16>, vector<128x64xbf16>, vector<16x64xf32> -> vector<16x64xf32>
    %c0_21 = arith.constant 0 : index
    %c0_22 = arith.constant 0 : index
    %27 = vector.load %arg9[%c0_21, %c0_22] : memref<1x64xf32, #tpu.memory_space<vmem>>, vector<1x64xf32>
    %28 = vector.broadcast %27 : vector<1x64xf32> to vector<16x64xf32>
    %29 = arith.addf %26, %28 : vector<16x64xf32>
    %cst_23 = arith.constant 0.000000e+00 : f32
    %30 = vector.broadcast %cst_23 : f32 to vector<16x64xf32>
    %31 = arith.maximumf %29, %30 : vector<16x64xf32>
    %32 = arith.truncf %31 : vector<16x64xf32> to vector<16x64xbf16>
    %c0_24 = arith.constant 0 : index
    %c0_25 = arith.constant 0 : index
    %33 = vector.load %arg10[%c0_24, %c0_25] : memref<64x32xbf16, #tpu.memory_space<vmem>>, vector<64x32xbf16>
    %cst_26 = arith.constant dense<0.000000e+00> : vector<16x32xf32>
    %34 = tpu.matmul %32, %33, %cst_26 {dimension_numbers = #tpu.dot_dimension_numbers<[1], [0], [0], [1], [0, 0, 1, 1], [], []>} : vector<16x64xbf16>, vector<64x32xbf16>, vector<16x32xf32> -> vector<16x32xf32>
    %c0_27 = arith.constant 0 : index
    %c0_28 = arith.constant 0 : index
    %35 = vector.load %arg11[%c0_27, %c0_28] : memref<1x32xf32, #tpu.memory_space<vmem>>, vector<1x32xf32>
    %36 = vector.broadcast %35 : vector<1x32xf32> to vector<16x32xf32>
    %37 = arith.addf %34, %36 : vector<16x32xf32>
    %cst_29 = arith.constant 0.000000e+00 : f32
    %38 = vector.broadcast %cst_29 : f32 to vector<16x32xf32>
    %39 = arith.maximumf %37, %38 : vector<16x32xf32>
    %c0_30 = arith.constant 0 : index
    %c0_31 = arith.constant 0 : index
    %40 = vector.load %arg12[%c0_30, %c0_31] : memref<32x128xf32, #tpu.memory_space<vmem>>, vector<32x128xf32>
    %cst_32 = arith.constant dense<0.000000e+00> : vector<16x128xf32>
    %41 = tpu.matmul %39, %40, %cst_32 {dimension_numbers = #tpu.dot_dimension_numbers<[1], [0], [0], [1], [0, 0, 1, 1], [], []>} : vector<16x32xf32>, vector<32x128xf32>, vector<16x128xf32> -> vector<16x128xf32>
    %c0_33 = arith.constant 0 : index
    %c0_34 = arith.constant 0 : index
    %42 = vector.load %arg13[%c0_33, %c0_34] : memref<1x128xf32, #tpu.memory_space<vmem>>, vector<1x128xf32>
    %43 = vector.broadcast %42 : vector<1x128xf32> to vector<16x128xf32>
    %44 = arith.addf %41, %43 : vector<16x128xf32>
    %c0_35 = arith.constant 0 : index
    %c0_36 = arith.constant 0 : index
    %45 = vector.load %arg14[%c0_35, %c0_36] : memref<16x128xf32, #tpu.memory_space<vmem>>, vector<16x128xf32>
    tpu.vector_store %arg14[%c0_35, %c0_36], %44 {strides = array<i32>} : memref<16x128xf32, #tpu.memory_space<vmem>>, vector<16x128xf32>,
    return
  }
  func.func @transform_0(%arg0: i32) -> (i32, i32) {
    %c0_i32 = arith.constant 0 : i32
    %c0_i32_0 = arith.constant 0 : i32
    return %arg0, %c0_i32 : i32, i32
  }
  func.func @transform_1(%arg0: i32) -> (i32, i32) {
    %c0_i32 = arith.constant 0 : i32
    %c0_i32_0 = arith.constant 0 : i32
    %c0_i32_1 = arith.constant 0 : i32
    return %c0_i32, %c0_i32_0 : i32, i32
  }
  func.func @transform_2(%arg0: i32) -> (i32, i32) {
    %c0_i32 = arith.constant 0 : i32
    %c0_i32_0 = arith.constant 0 : i32
    %c0_i32_1 = arith.constant 0 : i32
    return %c0_i32, %c0_i32_0 : i32, i32
  }
  func.func @transform_3(%arg0: i32) -> (i32, i32) {
    %c0_i32 = arith.constant 0 : i32
    %c0_i32_0 = arith.constant 0 : i32
    %c0_i32_1 = arith.constant 0 : i32
    return %c0_i32, %c0_i32_0 : i32, i32
  }
  func.func @transform_4(%arg0: i32) -> (i32, i32) {
    %c0_i32 = arith.constant 0 : i32
    %c0_i32_0 = arith.constant 0 : i32
    %c0_i32_1 = arith.constant 0 : i32
    return %c0_i32, %c0_i32_0 : i32, i32
  }
  func.func @transform_5(%arg0: i32) -> (i32, i32) {
    %c0_i32 = arith.constant 0 : i32
    %c0_i32_0 = arith.constant 0 : i32
    %c0_i32_1 = arith.constant 0 : i32
    return %c0_i32, %c0_i32_0 : i32, i32
  }
  func.func @transform_6(%arg0: i32) -> (i32, i32) {
    %c0_i32 = arith.constant 0 : i32
    %c0_i32_0 = arith.constant 0 : i32
    %c0_i32_1 = arith.constant 0 : i32
    return %c0_i32, %c0_i32_0 : i32, i32
  }
  func.func @transform_7(%arg0: i32) -> (i32, i32) {
    %c0_i32 = arith.constant 0 : i32
    %c0_i32_0 = arith.constant 0 : i32
    %c0_i32_1 = arith.constant 0 : i32
    return %c0_i32, %c0_i32_0 : i32, i32
  }
  func.func @transform_8(%arg0: i32) -> (i32, i32) {
    %c0_i32 = arith.constant 0 : i32
    %c0_i32_0 = arith.constant 0 : i32
    %c0_i32_1 = arith.constant 0 : i32
    return %c0_i32, %c0_i32_0 : i32, i32
  }
  func.func @transform_9(%arg0: i32) -> (i32, i32) {
    %c0_i32 = arith.constant 0 : i32
    %c0_i32_0 = arith.constant 0 : i32
    %c0_i32_1 = arith.constant 0 : i32
    return %c0_i32, %c0_i32_0 : i32, i32
  }
  func.func @transform_10(%arg0: i32) -> (i32, i32) {
    %c0_i32 = arith.constant 0 : i32
    %c0_i32_0 = arith.constant 0 : i32
    %c0_i32_1 = arith.constant 0 : i32
    return %c0_i32, %c0_i32_0 : i32, i32
  }
  func.func @transform_11(%arg0: i32) -> (i32, i32) {
    %c0_i32 = arith.constant 0 : i32
    %c0_i32_0 = arith.constant 0 : i32
    %c0_i32_1 = arith.constant 0 : i32
    return %c0_i32, %c0_i32_0 : i32, i32
  }
  func.func @transform_12(%arg0: i32) -> (i32, i32) {
    %c0_i32 = arith.constant 0 : i32
    %c0_i32_0 = arith.constant 0 : i32
    %c0_i32_1 = arith.constant 0 : i32
    return %c0_i32, %c0_i32_0 : i32, i32
  }
  func.func @transform_13(%arg0: i32) -> (i32, i32) {
    %c0_i32 = arith.constant 0 : i32
    %c0_i32_0 = arith.constant 0 : i32
    return %arg0, %c0_i32 : i32, i32
  }
}

</mosaic_0001>

<bundles_post_ra>
// kernel: bddqn_forward.1
= control target key start
LH: loop header
LB: loop body
LE: loop exit
PB: predicated region body
PF: predicated region fallthrough
CT: control target
= control target key end

     0   :  { %v1043_v1 = vmov 0   ;;  %v1044_v34 = vmov 0.0   ;;  %v65_v39 = vlaneseq  ;;  %vm1045_vm0 = vmmov 0   ;;  %s1337_s1 = inlined_call_operand.vmem [shape: bf16[128,256], index: 1, kind: input, shape index: {}]   ;;  %s1338_s0 = inlined_call_operand.vmem [shape: bf16[16,128], index: 0, kind: input, shape index: {}]   ;;  %s1339_s3 = inlined_call_operand.vmem [shape: bf16[256,128], index: 3, kind: input, shape index: {}]   ;;  %s1340_s5 = inlined_call_operand.vmem [shape: bf16[128,128], index: 5, kind: input, shape index: {}]   ;;  %s1341_s2 = inlined_call_operand.vmem [shape: f32[1,256], index: 2, kind: input, shape index: {}]   ;;  %s1342_s7 = inlined_call_operand.vmem [shape: bf16[128,64], index: 7, kind: input, shape index: {}]   ;;  %s1343_s4 = inlined_call_operand.vmem [shape: f32[1,128], index: 4, kind: input, shape index: {}]   ;;  %s1344_s9 = inlined_call_operand.vmem [shape: bf16[64,32], index: 9, kind: input, shape index: {}]   ;;  %s1345_s6 = inlined_call_operand.vmem [shape: f32[1,128], index: 6, kind: input, shape index: {}]   ;;  %s1346_s8 = inlined_call_operand.vmem [shape: f32[1,64], index: 8, kind: input, shape index: {}]   ;;  %s1347_s11 = inlined_call_operand.vmem [shape: f32[32,128], index: 11, kind: input, shape index: {}]   ;;  %s1348_s10 = inlined_call_operand.vmem [shape: f32[1,32], index: 10, kind: input, shape index: {}]   ;;  %s1349_s12 = inlined_call_operand.vmem [shape: f32[1,128], index: 12, kind: input, shape index: {}]   ;;  %s1350_s13 = inlined_call_operand.vmem [shape: f32[16,128], index: 13, kind: output, shape index: {}]  }
   0x1   :  { %v982_v0 = vld [vmem:[%s1337_s1 + $0x74] ss:$8 sps:$4 sm:$0xff]   ;;  %193 = vmatprep.mubr.bf16.mxu0 %v1043_v1  ;;  %v984_v2 = vld [vmem:[%s1337_s1 + $0x70] ss:$8 sps:$4 sm:$0xff]   ;;  %v985_v3 = vld [vmem:[%s1337_s1 + $0x64] ss:$8 sps:$4 sm:$0xff]  }
   0x2   :  { %161 = vmatprep.subr.bf16.mxu0 %v982_v0  ;;  %v987_v4 = vld [vmem:[%s1337_s1 + $0x60] ss:$8 sps:$4 sm:$0xff]   ;;  %v988_v5 = vld [vmem:[%s1337_s1 + $0x54] ss:$8 sps:$4 sm:$0xff]   ;;  %v990_v6 = vld [vmem:[%s1337_s1 + $0x50] ss:$8 sps:$4 sm:$0xff]  }
   0x3   :  { %162 = vmatpush1.bf16.msra.mxu0 %v984_v2  ;;  %v991_v7 = vld [vmem:[%s1337_s1 + $0x44] ss:$8 sps:$4 sm:$0xff]   ;;  %v993_v8 = vld [vmem:[%s1337_s1 + $0x40] ss:$8 sps:$4 sm:$0xff]   ;;  %v994_v9 = vld [vmem:[%s1337_s1 + $0x34] ss:$8 sps:$4 sm:$0xff]  }
   0x4   :  { %163 = vmatprep.subr.bf16.mxu0 %v985_v3  ;;  %v1007_v10 = vld [vmem:[%s1339_s3 + $0x78] sm:$0xff]   ;;  %v997_v13 = vld [vmem:[%s1337_s1 + $0x24] ss:$8 sps:$4 sm:$0xff]   ;;  %v1009_v14 = vld [vmem:[%s1339_s3 + $0x70] sm:$0xff]   ;;  %v66_v40 = vshrl.u32 %v65_v39, 7  ;;  %vm658_vm1 = vcmask 523264  }
   0x5   :  { %v996_v11 = vld [vmem:[%s1337_s1 + $0x30] ss:$8 sps:$4 sm:$0xff]   ;;  %865 = vmatprep.subr.bf16.mxu1 %v1007_v10  ;;  %v1011_v16 = vld [vmem:[%s1339_s3 + $0x68] sm:$0xff]   ;;  %v1000_v18 = vld [vmem:[%s1337_s1 + $0x14] ss:$8 sps:$4 sm:$0xff]   ;;  %vm716_vm2 = vcmask 261120  }
   0x6   :  { %v1008_v12 = vld [vmem:[%s1339_s3 + $0x38] sm:$0xff]   ;;  %v1010_v15 = vld [vmem:[%s1339_s3 + $0x30] sm:$0xff]   ;;  %v999_v17 = vld [vmem:[%s1337_s1 + $0x20] ss:$8 sps:$4 sm:$0xff]   ;;  %v71_v41 = vsub.s32 1, %v66_v40  ;;  %v67_v42 = vsub.s32 0, %v66_v40 }
   0x7   :  { %164 = vmatpush1.bf16.msra.mxu0 %v987_v4  ;;  %866 = vmatpush3.bf16.msra.mxu1 %v1008_v12  ;;  %v1012_v19 = vld [vmem:[%s1339_s3 + $0x28] sm:$0xff]   ;;  %v1013_v20 = vld [vmem:[%s1339_s3 + $0x60] sm:$0xff]   ;;  %v1002_v21 = vld [vmem:[%s1337_s1 + $0x10] ss:$8 sps:$4 sm:$0xff]  }
   0x8   :  { %165 = vmatprep.subr.bf16.mxu0 %v988_v5  ;;  %867 = vmatprep.subr.bf16.mxu1 %v1009_v14  ;;  %v1014_v22 = vld [vmem:[%s1339_s3 + $0x20] sm:$0xff]   ;;  %v1015_v24 = vld [vmem:[%s1339_s3 + $0x58] sm:$0xff]   ;;  %v1017_v28 = vld [vmem:[%s1339_s3 + $0x50] sm:$0xff]  }
   0x9   :  { %v1003_v23 = vld [vmem:[%s1337_s1 + $0x4] ss:$8 sps:$4 sm:$0xff]   ;;  %v1005_v25 = vld [vmem:[%s1337_s1] ss:$8 sps:$4 sm:$0xff]   ;;  %v1016_v26 = vld [vmem:[%s1339_s3 + $0x18] sm:$0xff]  }
   0xa   :  { %v1006_v27 = vld [vmem:[%s1338_s0] sm:$0xff]   ;;  %v1018_v29 = vld [vmem:[%s1339_s3 + $0x10] sm:$0xff]   ;;  %v1019_v30 = vld [vmem:[%s1339_s3 + $0x48] sm:$0xff]  }
   0xb   :  { %166 = vmatpush1.bf16.msra.mxu0 %v990_v6  ;;  %868 = vmatpush3.bf16.msra.mxu1 %v1010_v15  ;;  %v1020_v31 = vld [vmem:[%s1339_s3 + $0x8] sm:$0xff]   ;;  %v1021_v32 = vld [vmem:[%s1339_s3 + $0x40] sm:$0xff]   ;;  %v1023_v35 = vld [vmem:[%s1340_s5 + $0x38] sm:$0xff]  }
   0xc   :  { %167 = vmatprep.subr.bf16.mxu0 %v991_v7  ;;  %869 = vmatprep.subr.bf16.mxu1 %v1011_v16  ;;  %v1022_v33 = vld [vmem:[%s1339_s3] sm:$0xff]   ;;  %v1024_v36 = vld [vmem:[%s1340_s5 + $0x30] sm:$0xff]   ;;  %v1025_v37 = vld [vmem:[%s1340_s5 + $0x28] sm:$0xff]  }
   0xd   :  { %v1026_v38 = vld [vmem:[%s1340_s5 + $0x20] sm:$0xff]   ;;  %v1027_v60 = vld [vmem:[%s1340_s5 + $0x18] sm:$0xff]   ;;  %v1028_v61 = vld [vmem:[%s1340_s5 + $0x10] sm:$0xff]  }
   0xe   :  { %v63_v43 = vld [vmem:[%s1341_s2] sm:$0x3]  ;;  %v1029_v62 = vld [vmem:[%s1340_s5 + $0x8] sm:$0xff]   ;;  %v1031_v0 = vld [vmem:[%s1342_s7 + $0x38] sm:$0xff]  }
   0xf   :  { %168 = vmatpush1.bf16.msra.mxu0 %v993_v8  ;;  %870 = vmatpush3.bf16.msra.mxu1 %v1012_v19  ;;  %v72_v45 = vrot.slane %v63_v43, %v71_v41  ;;  %v68_v46 = vrot.slane %v63_v43, %v67_v42  ;;  %v1030_v63 = vld [vmem:[%s1340_s5] sm:$0xff]   ;;  %v1032_v1 = vld [vmem:[%s1342_s7 + $0x30] sm:$0xff]   ;;  %v1033_v2 = vld [vmem:[%s1342_s7 + $0x28] sm:$0xff]  }
  0x10   :  { %169 = vmatprep.subr.bf16.mxu0 %v994_v9  ;;  %871 = vmatprep.subr.bf16.mxu1 %v1013_v20  ;;  %v1034_v3 = vld [vmem:[%s1342_s7 + $0x20] sm:$0xff]   ;;  %v1035_v4 = vld [vmem:[%s1342_s7 + $0x18] sm:$0xff]  }
  0x11   :  { %v821_v8 = vld [vmem:[%s1343_s4] ss:$0 sm:$0xff]  ;;  %v1039_v20 = vld [vmem:[%s1344_s9 + $0x18] sm:$0xff]  }
  0x12   :  { %v1038_v19 = vld [vmem:[%s1342_s7] sm:$0xff]  }
  0x13   :  { %170 = vmatpush1.bf16.msra.mxu0 %v996_v11  ;;  %872 = vmatpush3.bf16.msra.mxu1 %v1014_v22 }
  0x14   :  { %171 = vmatprep.subr.bf16.mxu0 %v997_v13  ;;  %873 = vmatprep.subr.bf16.mxu1 %v1015_v24 }
  0x17   :  { %172 = vmatpush1.bf16.msra.mxu0 %v999_v17  ;;  %874 = vmatpush3.bf16.msra.mxu1 %v1016_v26  ;;  %v1036_v17 = vld [vmem:[%s1342_s7 + $0x10] sm:$0xff]  }
  0x18   :  { %173 = vmatprep.subr.bf16.mxu0 %v1000_v18  ;;  %875 = vmatprep.subr.bf16.mxu1 %v1017_v28  ;;  %v1037_v18 = vld [vmem:[%s1342_s7 + $0x8] sm:$0xff]  }
  0x1b   :  { %174 = vmatpush1.bf16.msra.mxu0 %v1002_v21  ;;  %876 = vmatpush3.bf16.msra.mxu1 %v1018_v29  ;;  %v838_v21 = vld [vmem:[%s1345_s6] ss:$0 sm:$0xff] }
  0x1c   :  { %175 = vmatprep.subr.bf16.mxu0 %v1003_v23  ;;  %877 = vmatprep.subr.bf16.mxu1 %v1019_v30 }
  0x1f   :  { %176 = vmatpush1.bf16.msra.mxu0 %v1005_v25  ;;  %878 = vmatpush3.bf16.msra.mxu1 %v1020_v31  ;;  %v1040_v31 = vld [vmem:[%s1344_s9 + $0x10] sm:$0xff]  }
  0x20   :  { %879 = vmatprep.subr.bf16.mxu1 %v1021_v32  ;;  %916 = vmatprep.subr.bf16.mxu0 %v1044_v34  ;;  %v1041_v32 = vld [vmem:[%s1344_s9 + $0x8] sm:$0xff]  }
  0x22   :  { %194 = vmatmul.mubr.bf16.vlgmr.msra.gmra.mxu0 %v1006_v27 }
  0x23   :  { %880 = vmatpush3.bf16.msra.mxu1 %v1022_v33  ;;  %917 = vmatpush3.bf16.msra.mxu0 %v1023_v35  ;;  %v1042_v33 = vld [vmem:[%s1344_s9] sm:$0xff]  }
  0x24   :  { %936 = vmatprep.subr.bf16.mxu1 %v1044_v34  ;;  %918 = vmatprep.subr.bf16.mxu0 %v1044_v34  ;;  %v847_v35 = vld [vmem:[%s1346_s8] ss:$0 sm:$0xff] }
  0x25   :  { %932 = vmatprep.mubr.msk.bf16.mxu0 %vm1045_vm0, %v1044_v34 }
  0x27   :  { %919 = vmatpush3.bf16.msra.mxu0 %v1024_v36 }
  0x28   :  { %920 = vmatprep.subr.bf16.mxu0 %v1044_v34 }
  0x2b   :  { %921 = vmatpush3.bf16.msra.mxu0 %v1025_v37 }
  0x2c   :  { %922 = vmatprep.subr.bf16.mxu0 %v1044_v34 }
  0x2f   :  { %923 = vmatpush3.bf16.msra.mxu0 %v1026_v38 }
  0x30   :  { %924 = vmatprep.subr.bf16.mxu0 %v1044_v34 }
  0x33   :  { %925 = vmatpush3.bf16.msra.mxu0 %v1027_v60 }
  0x34   :  { %926 = vmatprep.subr.bf16.mxu0 %v1044_v34 }
  0x37   :  { %927 = vmatpush3.bf16.msra.mxu0 %v1028_v61 }
  0x38   :  { %928 = vmatprep.subr.bf16.mxu0 %v1044_v34 }
  0x3b   :  { %929 = vmatpush3.bf16.msra.mxu0 %v1029_v62 }
  0x3c   :  { %930 = vmatprep.subr.bf16.mxu0 %v1044_v34 }
  0x3f   :  { %931 = vmatpush3.bf16.msra.mxu0 %v1030_v63 }
  0x40   :  { %956 = vmatprep.subr.bf16.mxu0 %v1044_v34 }
  0xe2   :  { %v195_v44 = vpop.f32.mrf.mxu0 }
  0xe3   :  { %v196_v51 = vadd.f32 %v195_v44, %v68_v46 }
  0xe4   :  { %v197_v47 = vpop.f32.mrf.mxu0 }
  0xe5   :  { %v198_v49 = vadd.f32 %v197_v47, %v72_v45  ;;  %v204_v57 = vmax.f32 %v196_v51, 0.0  ;;  %v705_v47 = vld [vmem:[%s1347_s11] sm:$0xff] }
  0xe6   :  { %v199_v48 = vpop.f32.mrf.mxu0 }
  0xe7   :  { %v200_v50 = vadd.f32 %v199_v48, %v68_v46  ;;  %v205_v55 = vmax.f32 %v198_v49, 0.0  ;;  %v706_v46 = vld [vmem:[%s1347_s11 + $0x8] sm:$0xff]  ;;  %v856_v48 = vld [vmem:[%s1348_s10] ss:$0 sm:$0xff] }
  0xe8   :  { %v201_v52 = vpop.f32.mrf.mxu0 }
  0xe9   :  { %v202_v53 = vadd.f32 %v201_v52, %v72_v45  ;;  %v206_v54 = vmax.f32 %v200_v50, 0.0  ;;  %v707_v45 = vld [vmem:[%s1347_s11 + $0x10] sm:$0xff] }
  0xeb   :  { %v207_v56 = vmax.f32 %v202_v53, 0.0  ;;  %v208_v59 = vpack.c.bf16 %v206_v54, %v204_v57  ;;  %v862_v57 = vld [vmem:[%s1349_s12] ss:$0 sm:$0xff] }
  0xed   :  { %v209_v58 = vpack.c.bf16 %v207_v56, %v205_v55 }
  0xef   :  { %377 = vmatprep.mubr.bf16.mxu1 %v209_v58 }
  0xf0   :  { %378 = vmatmul.mubr.bf16.vlgmr.msra.gmra.mxu1 %v208_v59 }
  0xf1   :  { %952 = vmatprep.mubr.msk.bf16.mxu1 %vm1045_vm0, %v1044_v34  ;;  %937 = vmatpush3.bf16.msra.mxu1 %v1031_v0 }
  0xf2   :  { %938 = vmatprep.subr.bf16.mxu1 %v1044_v34 }
  0xf5   :  { %939 = vmatpush3.bf16.msra.mxu1 %v1032_v1 }
  0xf6   :  { %940 = vmatprep.subr.bf16.mxu1 %v1044_v34 }
  0xf9   :  { %941 = vmatpush3.bf16.msra.mxu1 %v1033_v2 }
  0xfa   :  { %942 = vmatprep.subr.bf16.mxu1 %v1044_v34 }
  0xfd   :  { %943 = vmatpush3.bf16.msra.mxu1 %v1034_v3 }
  0xfe   :  { %944 = vmatprep.subr.bf16.mxu1 %v1044_v34 }
 0x101   :  { %945 = vmatpush3.bf16.msra.mxu1 %v1035_v4 }
 0x102   :  { %946 = vmatprep.subr.bf16.mxu1 %v1044_v34 }
 0x105   :  { %947 = vmatpush3.bf16.msra.mxu1 %v1036_v17 }
 0x106   :  { %948 = vmatprep.subr.bf16.mxu1 %v1044_v34 }
 0x109   :  { %949 = vmatpush3.bf16.msra.mxu1 %v1037_v18 }
 0x10a   :  { %950 = vmatprep.subr.bf16.mxu1 %v1044_v34 }
 0x10d   :  { %951 = vmatpush3.bf16.msra.mxu1 %v1038_v19 }
 0x1b0   :  { %v881_v5 = vpop.f32.mrf.mxu1 }
 0x1b2   :  { %v882_v6 = vpop.f32.mrf.mxu1 }
 0x1b3   :  { %v883_v7 = vadd.f32 %v882_v6, %v881_v5 }
 0x1b4   :  { %v884_v9 = vpop.f32.mrf.mxu1 }
 0x1b5   :  { %v380_v11 = vadd.f32 %v883_v7, %v821_v8 }
 0x1b6   :  { %v885_v10 = vpop.f32.mrf.mxu1 }
 0x1b7   :  { %v886_v12 = vadd.f32 %v885_v10, %v884_v9  ;;  %v386_v14 = vmax.f32 %v380_v11, 0.0 }
 0x1b9   :  { %v383_v13 = vadd.f32 %v886_v12, %v821_v8 }
 0x1bb   :  { %v387_v15 = vmax.f32 %v383_v13, 0.0 }
 0x1bd   :  { %v388_v16 = vpack.c.bf16 %v387_v15, %v386_v14 }
 0x1bf   :  { %933 = vmatmul.mubr.bf16.vlgmr.msra.gmra.mxu0 %v388_v16 }
 0x1c0   :  { %964 = vmatprep.mubr.msk.bf16.mxu0 %vm1045_vm0, %v1044_v34  ;;  %957 = vmatpush3.bf16.msra.mxu0 %v1039_v20 }
 0x1c1   :  { %958 = vmatprep.subr.bf16.mxu0 %v1044_v34 }
 0x1c4   :  { %959 = vmatpush3.bf16.msra.mxu0 %v1040_v31 }
 0x1c5   :  { %960 = vmatprep.subr.bf16.mxu0 %v1044_v34 }
 0x1c8   :  { %961 = vmatpush3.bf16.msra.mxu0 %v1041_v32 }
 0x1c9   :  { %962 = vmatprep.subr.bf16.mxu0 %v1044_v34  ;;  %v708_v34 = vld [vmem:[%s1347_s11 + $0x18] sm:$0xff] }
 0x1ca   :  { %968 = vmatprep.subr.mxu1 %v708_v34 }
 0x1cc   :  { %963 = vmatpush3.bf16.msra.mxu0 %v1042_v33 }
 0x27f   :  { %v494_v22 = vpop.f32.mrf.mxu0 }
 0x280   :  { %v495_v24 = vadd.f32 %v838_v21, %v494_v22 }
 0x281   :  { %v934_v23 = vpop.f32.mrf.mxu0 }
 0x282   :  { %v501_v28 = vmax.f32 %v495_v24, 0.0 }
 0x283   :  { %v497_v25 = vpop.f32.mrf.mxu0 }
 0x284   :  { %v498_v26 = vadd.f32 %v838_v21, %v497_v25 }
 0x285   :  { %v935_v27 = vpop.f32.mrf.mxu0 }
 0x286   :  { %v502_v29 = vmax.f32 %v498_v26, 0.0 }
 0x288   :  { %v503_v30 = vpack.c.bf16 %v502_v29, %v501_v28 }
 0x28a   :  { %953 = vmatmul.mubr.bf16.vlgmr.msra.gmra.mxu1 %v503_v30 }
 0x28b   :  { %969 = vmatpush3.msra.mxu1 %v708_v34 }
 0x28c   :  { %970 = vmatprep.subr.mxu1 %v707_v45 }
 0x28d   :  { %971 = vmatpush3.msra.mxu1 %v707_v45 }
 0x28e   :  { %972 = vmatprep.subr.mxu1 %v706_v46 }
 0x28f   :  { %973 = vmatpush3.msra.mxu1 %v706_v46 }
 0x290   :  { %974 = vmatprep.subr.mxu1 %v705_v47 }
 0x291   :  { %975 = vmatpush3.msra.mxu1 %v705_v47 }
 0x34a   :  { %v609_v36 = vpop.f32.mrf.mxu1 }
 0x34b   :  { %v610_v38 = vadd.f32 %v847_v35, %v609_v36 }
 0x34c   :  { %v954_v37 = vpop.f32.mrf.mxu1 }
 0x34d   :  { %v616_v42 = vmax.f32 %v610_v38, 0.0 }
 0x34e   :  { %v612_v39 = vpop.f32.mrf.mxu1 }
 0x34f   :  { %v613_v40 = vadd.f32 %v847_v35, %v612_v39 }
 0x350   :  { %v955_v41 = vpop.f32.mrf.mxu1 }
 0x351   :  { %v617_v43 = vmax.f32 %v613_v40, 0.0 }
 0x353   :  { %v618_v44 = vpack.c.bf16 %v617_v43, %v616_v42 }
 0x355   :  { %965 = vmatmul.mubr.msk.bf16.vlgmr.msra.gmra.mxu0 %vm658_vm1, %v618_v44 }
 0x415   :  { %v696_v49 = vpop.f32.mrf.mxu0 }
 0x416   :  { %v697_v50 = vadd.f32 %v856_v48, %v696_v49 }
 0x417   :  { %v966_v51 = vpop.f32.mrf.mxu0 }
 0x418   :  { %v703_v52 = vmax.f32 %v697_v50, 0.0 }
 0x419   :  { %v699_v53 = vpop.f32.mrf.mxu0 }
 0x41a   :  { %v700_v54 = vadd.f32 %v856_v48, %v699_v53  ;;  %976 = vmatprep.mubr.msk.f32.mxu1 %vm716_vm2, %v703_v52 }
 0x41b   :  { %v967_v55 = vpop.f32.mrf.mxu0 }
 0x41c   :  { %v704_v56 = vmax.f32 %v700_v54, 0.0 }
 0x41e   :  { %977 = vmatmul.mubr.msk.f32.vlgmr.msra.gmra.mxu1 %vm716_vm2, %v704_v56 }
 0x4de   :  { %v978_v58 = vpop.f32.mrf.mxu1 }
 0x4df   :  { %v795_v59 = vadd.f32 %v978_v58, %v862_v57 }
 0x4e0   :  { %v789_v60 = vpop.f32.mrf.mxu1 }
 0x4e1   :  { %799 = vst [vmem:[%s1350_s13 + $0x8] sm:$0xff] %v795_v59  ;;  %v790_v61 = vadd.f32 %v862_v57, %v789_v60 }
 0x4e3   :  { %798 = vst [vmem:[%s1350_s13] sm:$0xff] %v790_v61 }

</bundles_post_ra>
